<compile_context>
chip_gen: v6e
topology: v6e:2x2x1
jax: 0.10.0
libtpu: 0.0.40
codegen_flags: <defaults>
</compile_context>

<pallas_src>
import functools

import jax
import jax.numpy as jnp
from jax.experimental import pallas as pl
from jax.experimental.pallas import tpu as pltpu


def _round_up(x, m):
    return ((x + m - 1) // m) * m


def _regression_kernel(x_ref, w_ref, b_ref, o_ref, *, activation):
    # x_ref: (TM, n_in)   w_ref: (n_in, n_out)   b_ref: (1, n_out)   o_ref: (TM, n_out)
    y = jnp.dot(x_ref[...], w_ref[...], preferred_element_type=jnp.float32)
    y = y + b_ref[...].astype(jnp.float32)  # broadcast bias over batch rows

    if activation == "relu":
        y = jnp.maximum(y, 0.0)
    elif activation == "softplus":
        # PyTorch Softplus (beta=1, threshold=20): y > 20 -> identity
        y = jnp.where(y > 20.0, y, jnp.log1p(jnp.exp(jnp.minimum(y, 20.0))))
    # 'linear' / None / unknown -> identity

    o_ref[...] = y.astype(o_ref.dtype)


def regression_forward(x, weight, bias, activation, *, target_tile_bytes=4 << 20):
    """x: (B, n_in), weight: (n_out, n_in), bias: (n_out,)."""
    B, n_in = x.shape
    n_out = weight.shape[0]

    act = (activation or "linear").lower()
    if act not in ("relu", "softplus", "linear"):
        act = "linear"

    # Pin parameter dtypes to x's dtype (avoid mixed-dtype lowering) and do the
    # one-time weight transpose in the wrapper (tiny; keeps the XLU out of the
    # per-step kernel body).
    w_t = weight.astype(x.dtype).T.copy()        # (n_in, n_out)
    b2 = bias.astype(x.dtype).reshape(1, n_out)  # (1, n_out)

    # --- TM sized by bytes: target ~4 MiB of (x-tile + out-tile); with
    # double-buffering that's ~8 MiB of pipeline state, inside v5e's 16 MiB
    # scoped-VMEM default (weight/bias are negligible at head sizes).
    itemsize = jnp.dtype(x.dtype).itemsize
    row_bytes = (n_in + n_out) * itemsize
    tm_from_bytes = max(8, (target_tile_bytes // max(row_bytes, 1)) // 8 * 8)
    # Keep >=2 grid steps when B allows it (v7x: 2 TensorCores share the grid).
    tm_cap = _round_up(max(pl.cdiv(B, 2), 8), 8)
    TM = max(8, min(tm_from_bytes, tm_cap))

    kernel = functools.partial(_regression_kernel, activation=act)

    flops = 2 * B * n_in * n_out + 2 * B * n_out
    transcendentals = 2 * B * n_out if act == "softplus" else 0
    bytes_accessed = (B * n_in + n_in * n_out + n_out + B * n_out) * itemsize
    cost = pl.CostEstimate(
        flops=flops, transcendentals=transcendentals, bytes_accessed=bytes_accessed
    )

    out = pl.pallas_call(
        kernel,
        out_shape=jax.ShapeDtypeStruct((B, n_out), x.dtype),
        # No wrapper-side batch padding: ragged final block handled by Pallas.
        grid=(pl.cdiv(B, TM),),
        in_specs=[
            # x: tiled along the batch axis.
            pl.BlockSpec((TM, n_in), lambda i: (i, 0)),
            # weight/bias: constant index_map -> loaded once, VMEM-resident.
            pl.BlockSpec((n_in, n_out), lambda i: (0, 0)),
            pl.BlockSpec((1, n_out), lambda i: (0, 0)),
        ],
        # Last block dim == full n_out (legal without 128-padding); avoids
        # 8-17x extra output HBM traffic and the post-slice kernel.
        out_specs=pl.BlockSpec((TM, n_out), lambda i: (i, 0)),
        compiler_params=pltpu.CompilerParams(
            dimension_semantics=("parallel",),
        ),
        cost_estimate=cost,
    )(x, w_t, b2)

    return out


def _init_linear_params(key, n_in, n_out, dtype=jnp.float32):
    # Deterministic init mimicking nn.Linear's uniform(-1/sqrt(n_in), 1/sqrt(n_in)).
    kw, kb = jax.random.split(key)
    bound = 1.0 / (n_in ** 0.5)
    weight = jax.random.uniform(kw, (n_out, n_in), dtype, minval=-bound, maxval=bound)
    bias = jax.random.uniform(kb, (n_out,), dtype, minval=-bound, maxval=bound)
    return weight, bias


if __name__ == "__main__":
    key = jax.random.PRNGKey(0)
    k_x, k_p = jax.random.split(key)

    B, n_in, n_out = 8, 32, 16
    x = jax.random.normal(k_x, (B, n_in), jnp.float32)
    weight, bias = _init_linear_params(k_p, n_in, n_out)

    def ref_fwd(xv, act):
        r = xv @ weight.T + bias
        if act == "relu":
            r = jnp.maximum(r, 0.0)
        elif act == "softplus":
            r = jnp.where(r > 20.0, r, jnp.log1p(jnp.exp(jnp.minimum(r, 20.0))))
        return r

    for act in ("relu", "softplus", "linear", None):
        out = jax.block_until_ready(regression_forward(x, weight, bias, act))
        a = (act or "linear").lower()
        ref = ref_fwd(x, a)
        assert out.shape == (B, n_out)
        assert jnp.allclose(out, ref, atol=1e-5, rtol=1e-5), f"mismatch for {act}"

    # Larger, non-multiple batch: exercises the ragged final block and the
    # >=2-step grid path (both TensorCores on v7x).
    Bl = 1234
    xl = jax.random.normal(k_x, (Bl, n_in), jnp.float32)
    outl = jax.block_until_ready(regression_forward(xl, weight, bias, "softplus"))
    refl = ref_fwd(xl, "softplus")
    assert outl.shape == (Bl, n_out)
    assert jnp.allclose(outl, refl, atol=1e-5, rtol=1e-5), "mismatch for large batch"

    print("KERNEL_OK")
</pallas_src>

<mosaic_0001>
module attributes {stable_mosaic.version = 11 : i64} {
  func.func @_regression_kernel(%arg0: i32, %arg1: memref<8x32xf32, #tpu.memory_space<vmem>>, %arg2: memref<32x16xf32, #tpu.memory_space<vmem>>, %arg3: memref<1x16xf32, #tpu.memory_space<vmem>>, %arg4: memref<8x16xf32, #tpu.memory_space<vmem>>) attributes {dimension_semantics = [#tpu.dimension_semantics<parallel>], iteration_bounds = array<i64: 1>, scalar_prefetch = 0 : i64, scratch_operands = 0 : i64, tpu.core_type = #tpu.core_type<tc>, window_params = [{transform_indices = @transform_0, window_bounds = array<i64: 8, 32>}, {pipeline_mode = #tpu.pipeline_mode<synchronous>, transform_indices = @transform_1, window_bounds = array<i64: 32, 16>}, {pipeline_mode = #tpu.pipeline_mode<synchronous>, transform_indices = @transform_2, window_bounds = array<i64: 1, 16>}, {transform_indices = @transform_3, window_bounds = array<i64: 8, 16>}]} {
    %c0 = arith.constant 0 : index
    %c0_0 = arith.constant 0 : index
    %0 = vector.load %arg1[%c0, %c0_0] : memref<8x32xf32, #tpu.memory_space<vmem>>, vector<8x32xf32>
    %c0_1 = arith.constant 0 : index
    %c0_2 = arith.constant 0 : index
    %1 = vector.load %arg2[%c0_1, %c0_2] : memref<32x16xf32, #tpu.memory_space<vmem>>, vector<32x16xf32>
    %cst = arith.constant dense<0.000000e+00> : vector<8x16xf32>
    %2 = tpu.matmul %0, %1, %cst {dimension_numbers = #tpu.dot_dimension_numbers<[1], [0], [0], [1], [0, 0, 1, 1], [], []>} : vector<8x32xf32>, vector<32x16xf32>, vector<8x16xf32> -> vector<8x16xf32>
    %c0_3 = arith.constant 0 : index
    %c0_4 = arith.constant 0 : index
    %3 = vector.load %arg3[%c0_3, %c0_4] : memref<1x16xf32, #tpu.memory_space<vmem>>, vector<1x16xf32>
    %4 = vector.broadcast %3 : vector<1x16xf32> to vector<8x16xf32>
    %5 = arith.addf %2, %4 : vector<8x16xf32>
    %cst_5 = arith.constant 0.000000e+00 : f32
    %6 = vector.broadcast %cst_5 : f32 to vector<8x16xf32>
    %7 = arith.maximumf %5, %6 : vector<8x16xf32>
    %c0_6 = arith.constant 0 : index
    %c0_7 = arith.constant 0 : index
    %8 = vector.load %arg4[%c0_6, %c0_7] : memref<8x16xf32, #tpu.memory_space<vmem>>, vector<8x16xf32>
    tpu.vector_store %arg4[%c0_6, %c0_7], %7 {strides = array<i32>} : memref<8x16xf32, #tpu.memory_space<vmem>>, vector<8x16xf32>,
    return
  }
  func.func @transform_0(%arg0: i32) -> (i32, i32) {
    %c0_i32 = arith.constant 0 : i32
    %c0_i32_0 = arith.constant 0 : i32
    return %arg0, %c0_i32 : i32, i32
  }
  func.func @transform_1(%arg0: i32) -> (i32, i32) {
    %c0_i32 = arith.constant 0 : i32
    %c0_i32_0 = arith.constant 0 : i32
    %c0_i32_1 = arith.constant 0 : i32
    return %c0_i32, %c0_i32_0 : i32, i32
  }
  func.func @transform_2(%arg0: i32) -> (i32, i32) {
    %c0_i32 = arith.constant 0 : i32
    %c0_i32_0 = arith.constant 0 : i32
    %c0_i32_1 = arith.constant 0 : i32
    return %c0_i32, %c0_i32_0 : i32, i32
  }
  func.func @transform_3(%arg0: i32) -> (i32, i32) {
    %c0_i32 = arith.constant 0 : i32
    %c0_i32_0 = arith.constant 0 : i32
    return %arg0, %c0_i32 : i32, i32
  }
}

</mosaic_0001>

<bundles_post_ra>
// kernel: tpu_custom_call.1
= control target key start
LH: loop header
LB: loop body
LE: loop exit
PB: predicated region body
PF: predicated region fallthrough
CT: control target
= control target key end

     0   :  { %v161_v1 = vmov 0.0   ;;  %vm162_vm0 = vmmov 0   ;;  %s205_s0 = inlined_call_operand.vmem [shape: f32[8,32], index: 0, kind: input, shape index: {}]   ;;  %s206_s1 = inlined_call_operand.vmem [shape: f32[32,16], index: 1, kind: input, shape index: {}]   ;;  %s207_s2 = inlined_call_operand.vmem [shape: f32[1,16], index: 2, kind: input, shape index: {}]   ;;  %s208_s3 = inlined_call_operand.hbm [shape: f32[8,16], index: 3, kind: output, shape index: {}]  }
   0x1   :  { %v19_v0 = vld [vmem:[%s206_s1 + $0x18] sm:$0xff]  ;;  %125 = vmatprep.subr.mxu0 %v161_v1  ;;  %v18_v2 = vld [vmem:[%s206_s1 + $0x10] sm:$0xff]  ;;  %133 = vmatprep.mubr.msk.f32.mxu0 %vm162_vm0, %v161_v1 }
   0x2   :  { %126 = vmatpush3.msra.mxu0 %v19_v0 }
   0x3   :  { %8 = vsyncpa [#allocation3], 0  ;;  %127 = vmatprep.subr.mxu0 %v161_v1  ;;  %v17_v3 = vld [vmem:[%s206_s1 + $0x8] sm:$0xff]  ;;  %v16_v4 = vld [vmem:[%s206_s1] sm:$0xff]  ;;  %vm27_vm1 = vcmask 261120   ;;  %s163_s24 = smov [#allocation2]  }
   0x4   :  { %128 = vmatpush3.msra.mxu0 %v18_v2  ;;  %v15_v5 = vld [vmem:[%s205_s0] sm:$0xff]  ;;  %s110_s25 = sshll.u32 %s163_s24, 4  ;;  %vm102_vm2 = vcmask 130048   ;;  %s111_s25 = int_to_ptr.vmem [resolvable:$true] %s110_s25 }
   0x5   :  { %129 = vmatprep.subr.mxu0 %v161_v1  ;;  %v118_v6 = vld [vmem:[%s207_s2] ss:$0 sm:$0xff]  ;;  %s139_s1 = scalar_lea.vmem %s111_s25, 128  ;;  %p144_p1 = scmp.lt.s32.totalorder %s111_s25, %s111_s25 }
   0x6   :  { %130 = vmatpush3.msra.mxu0 %v17_v3  ;;  %p140_p0 = scmp.ne.s32.totalorder %s111_s25, %s139_s1  ;;  %p145_p2 = scmp.lt.s32.totalorder %s139_s1, %s139_s1 }
   0x7   :  { %131 = vmatprep.subr.mxu0 %v161_v1 }
   0x8   :  { %132 = vmatpush3.msra.mxu0 %v16_v4  ;;  %p146_p3 = por %p145_p2, %p144_p1 }
   0x9   :  { %134 = vmatmul.mubr.msk.f32.vlgmr.msra.gmra.mxu0 %vm27_vm1, %v15_v5 }
   0xa   :  { %p147_p4 = pnand %p146_p3, %p140_p0 }
  0xc9   :  { %v97_v7 = vpop.f32.mrf.mxu0 }
  0xca   :  { %v98_v8 = vadd.f32 %v118_v6, %v97_v7 }
  0xcb   :  { %v135_v9 = vpop.f32.mrf.mxu0 }
  0xcc   :  { %v101_v10 = vmax.f32 %v98_v8, 0.0 }
  0xce   :  { %103 = vst.msk [vmem:[#allocation2] sm:$0xff] %vm102_vm2, %v101_v10 }
  0xcf   :  { %150 = shalt.err (!%p147_p4)
}
  0xd0   :  { %113 = dma.vmem_to_hbm [thread:$0]  %s111_s25, 128, %s208_s3, [#allocation3]  }
  0xd1   :  { %159 = dma.done.wait [#allocation3], 128  }
  0xd2   :  { %160 = vsyncadd [#allocation3], 4294967168 }
  0xd3   :  { %117 = vsyncpa [#allocation3], 1 }

</bundles_post_ra>
